<compile_context>
chip_gen: v6e
topology: v6e:2x2x1
jax: 0.10.0
libtpu: 0.0.40
codegen_flags: <defaults>
</compile_context>

<pallas_src>
import jax
import jax.numpy as jnp
from jax.experimental import pallas as pl
from jax.experimental.pallas import tpu as pltpu

_LANE = 128
_MIB = 1024 * 1024


def _round_up(x, m):
    return (x + m - 1) // m * m


# --------------------------------------------------------------------------
# Kernel
# --------------------------------------------------------------------------
def _qkv_kernel(m_ref, x_ref, w_ref, q_ref, k_ref, v_ref):
    # m_ref : (Bt, N, D)      memory rows for this batch tile
    # x_ref : (B,  1, D)      full x, resident (constant index map)
    # w_ref : (D, 3*Dp)       fused [Wq^T | Wk^T | Wv^T], each padded to Dp lanes
    # q_ref : (Bt, N,   Dp)
    # k_ref : (Bt, N+1, Dp)
    # v_ref : (Bt, N+1, Dp)
    bt, n, d = m_ref.shape
    dp = q_ref.shape[-1]

    # Flatten batch*memory rows -> big MXU M-dimension.
    m2 = m_ref[...].reshape(bt * n, d)                               # (Bt*N, D)

    # Per-projection dots; weight column slices are lane-tile aligned
    # (Dp % 128 == 0) and each f32 result is cast + stored immediately so the
    # largest live f32 intermediate is (Bt*N, Dp), not (Bt*N, 3*Dp).
    q = jnp.dot(m2, w_ref[:, :dp], preferred_element_type=jnp.float32)
    q_ref[...] = q.reshape(bt, n, dp).astype(q_ref.dtype)

    k = jnp.dot(m2, w_ref[:, dp:2 * dp], preferred_element_type=jnp.float32)
    k_ref[:, :n, :] = k.reshape(bt, n, dp).astype(k_ref.dtype)

    v = jnp.dot(m2, w_ref[:, 2 * dp:3 * dp], preferred_element_type=jnp.float32)
    v_ref[:, :n, :] = v.reshape(bt, n, dp).astype(v_ref.dtype)

    # Appended x row -> row N of k/v.  x stays resident; slice this step's
    # batch rows.  Only the k/v weight columns are used (q(x) is not needed).
    row0 = pl.multiple_of(pl.program_id(0) * bt, bt)
    xr = x_ref[pl.ds(row0, bt), :, :].reshape(bt, d)                 # (Bt, D)
    xkv = jnp.dot(xr, w_ref[:, dp:3 * dp],
                  preferred_element_type=jnp.float32)                # (Bt, 2*Dp)
    k_ref[:, n, :] = xkv[:, :dp].astype(k_ref.dtype)
    v_ref[:, n, :] = xkv[:, dp:].astype(v_ref.dtype)


# --------------------------------------------------------------------------
# Parameter-load-time weight fusion (call once, not per forward)
# --------------------------------------------------------------------------
def fuse_qkv_weights(wq, wk, wv, *, lane_multiple=_LANE):
    """Fuse PyTorch-style (out, in) Linear weights into one (D, 3*Dp) matrix.

    Each projection's transposed weight is zero-padded along its output
    (lane) dim to Dp = round_up(D, lane_multiple) so kernel stores are
    lane-dense and the per-projection column slices are tile aligned.
    y = lhs @ W gives columns [q | k | v], each Dp wide (zeros in the pad).
    """
    D = wq.shape[1]
    Dp = D if D % lane_multiple == 0 else _round_up(D, lane_multiple)

    def prep(w):
        wt = jnp.asarray(w).T                     # (in=D, out=D)
        if Dp != D:
            wt = jnp.pad(wt, ((0, 0), (0, Dp - D)))   # zero-fill pad columns
        return wt

    return jnp.concatenate([prep(wq), prep(wk), prep(wv)], axis=1)   # (D, 3*Dp)


# --------------------------------------------------------------------------
# Generation-aware sizing helpers
# --------------------------------------------------------------------------
def _tpu_vmem_and_cores():
    """(physical VMEM bytes per TensorCore, TensorCores per chip).

    Conservative fallbacks: 64 MiB (v7x physical, smallest across
    v5e/v6e/v7x) and 1 core (v5e/v6e)."""
    vmem = 64 * _MIB
    cores = 1
    try:
        info = pltpu.get_tpu_info()
        vmem = int(getattr(info, "vmem_capacity_bytes", vmem) or vmem)
        for attr in ("num_cores", "core_count", "num_tensorcores"):
            val = getattr(info, attr, None)
            if val:
                cores = int(val)
                break
    except Exception:
        pass
    return vmem, cores


def _vmem_bytes_per_step(bt, B, N, D, Dp, in_item, out_item,
                         single_buffer_resident=True):
    """Approximate VMEM footprint of one grid step (buffers + live temps)."""
    resident = 1 if single_buffer_resident else 2
    m_in = 2 * bt * N * D * in_item                  # M tile, double-buffered
    x_in = resident * B * 1 * D * in_item            # resident full x
    w_in = resident * D * 3 * Dp * in_item           # resident fused weight
    q_out = 2 * bt * N * Dp * out_item               # double-buffered outputs
    kv_out = 2 * 2 * bt * (N + 1) * Dp * out_item
    lhs_f = bt * N * D * in_item                     # flattened LHS copy
    acc_f = bt * N * Dp * 4                          # largest live f32 result
    return m_in + x_in + w_in + q_out + kv_out + lhs_f + acc_f


def _pick_batch_tile(B, need_fn, budget, num_cores):
    """Largest divisor of B fitting the VMEM budget; on multi-TC chips prefer
    tiles that leave >= num_cores grid steps (so the 'parallel' batch axis
    actually shards across TensorCores)."""
    divisors = [d for d in range(B, 0, -1) if B % d == 0]
    if num_cores > 1 and B >= num_cores:
        for bt in divisors:
            if B // bt >= num_cores and need_fn(bt) <= budget:
                return bt
    for bt in divisors:
        if need_fn(bt) <= budget:
            return bt
    return 1


# --------------------------------------------------------------------------
# Wrapper
# --------------------------------------------------------------------------
def map_to_qkv(M, x, w_qkv, *, batch_tile=None):
    """Pallas equivalent of MapToQKV.forward.

    M      : (B, N, D) activations
    x      : (B, D)    appended row
    w_qkv  : (D, 3*Dp) fused weights from `fuse_qkv_weights`
    Returns (q, k, v) with shapes (B, N, D), (B, N+1, D), (B, N+1, D).
    """
    B, N, D = M.shape
    assert x.shape == (B, D)
    assert w_qkv.shape[0] == D and w_qkv.shape[1] % 3 == 0
    Dp = w_qkv.shape[1] // 3
    assert Dp >= D and (Dp == D or Dp % _LANE == 0), "weights not fused/padded correctly"

    in_item = jnp.dtype(M.dtype).itemsize
    out_item = in_item

    vmem_cap, num_cores = _tpu_vmem_and_cores()
    tile_budget = int(vmem_cap * 0.7)

    def need(bt):
        return _vmem_bytes_per_step(bt, B, N, D, Dp, in_item, out_item)

    bt = batch_tile if batch_tile is not None else _pick_batch_tile(
        B, need, tile_budget, num_cores)
    assert B % bt == 0, f"batch_tile {bt} must divide batch {B}"

    vmem_limit = min(int(vmem_cap * 0.85), max(32 * _MIB, need(bt) + 8 * _MIB))

    x3 = x[:, None, :]  # (B, 1, D) — metadata reshape, no copy / no concat

    out_shapes = (
        jax.ShapeDtypeStruct((B, N, Dp), M.dtype),
        jax.ShapeDtypeStruct((B, N + 1, Dp), M.dtype),
        jax.ShapeDtypeStruct((B, N + 1, Dp), M.dtype),
    )

    flops = 2 * B * N * D * (3 * Dp) + 2 * B * D * (2 * Dp)
    bytes_accessed = (in_item * (B * N * D + B * D + D * 3 * Dp)
                      + out_item * (B * N * Dp + 2 * B * (N + 1) * Dp))

    def build(single_buffer_resident):
        resident_kw = ({"pipeline_mode": pl.Buffered(1)}
                       if single_buffer_resident else {})
        grid_spec = pltpu.PrefetchScalarGridSpec(
            num_scalar_prefetch=0,
            grid=(B // bt,),
            in_specs=[
                pl.BlockSpec((bt, N, D), lambda b: (b, 0, 0)),          # M tile
                pl.BlockSpec((B, 1, D), lambda b: (0, 0, 0),            # resident x
                             **resident_kw),
                pl.BlockSpec((D, 3 * Dp), lambda b: (0, 0),             # resident W
                             **resident_kw),
            ],
            out_specs=[
                pl.BlockSpec((bt, N, Dp), lambda b: (b, 0, 0)),         # q
                pl.BlockSpec((bt, N + 1, Dp), lambda b: (b, 0, 0)),     # k
                pl.BlockSpec((bt, N + 1, Dp), lambda b: (b, 0, 0)),     # v
            ],
        )
        return pl.pallas_call(
            _qkv_kernel,
            out_shape=out_shapes,
            grid_spec=grid_spec,
            compiler_params=pltpu.CompilerParams(
                dimension_semantics=("parallel",),
                vmem_limit_bytes=vmem_limit),
            cost_estimate=pl.CostEstimate(
                flops=flops, transcendentals=0, bytes_accessed=bytes_accessed),
        )

    try:
        q, k, v = build(True)(M, x3, w_qkv)
    except Exception:
        # Fallback: default double-buffering if pl.Buffered(1) is rejected.
        q, k, v = build(False)(M, x3, w_qkv)

    if Dp != D:
        # Padded weight columns are zero-filled, so the tail lanes are zeros;
        # slice back to the module's exact output width.
        q, k, v = q[..., :D], k[..., :D], v[..., :D]
    return q, k, v


# --------------------------------------------------------------------------
# Pure-JAX reference (matches the PyTorch module)
# --------------------------------------------------------------------------
def _reference(M, x, wq, wk, wv):
    Mx = jnp.concatenate([M, x[:, None, :]], axis=-2)
    q = jnp.einsum("bnd,od->bno", M, wq)
    k = jnp.einsum("bnd,od->bno", Mx, wk)
    v = jnp.einsum("bnd,od->bno", Mx, wv)
    return q, k, v


if __name__ == "__main__":
    # Small shapes consistent with the module: batch=2, num_memories=8,
    # size_memory=32.  (bf16 activations/weights also work — caller choice.)
    B, N, D = 2, 8, 32
    key = jax.random.PRNGKey(0)
    k_m, k_x, k_q, k_k, k_v = jax.random.split(key, 5)

    M = jax.random.normal(k_m, (B, N, D), dtype=jnp.float32)
    x = jax.random.normal(k_x, (B, D), dtype=jnp.float32)

    # Deterministic Linear(size_memory, size_memory, bias=False) weights,
    # PyTorch-style uniform(-1/sqrt(D), 1/sqrt(D)), shape (out, in).
    bound = 1.0 / (D ** 0.5)
    wq = jax.random.uniform(k_q, (D, D), jnp.float32, -bound, bound)
    wk = jax.random.uniform(k_k, (D, D), jnp.float32, -bound, bound)
    wv = jax.random.uniform(k_v, (D, D), jnp.float32, -bound, bound)

    # Fuse / transpose / lane-pad weights once (parameter-load time).
    w_qkv = fuse_qkv_weights(wq, wk, wv)

    q, k, v = map_to_qkv(M, x, w_qkv)
    jax.block_until_ready((q, k, v))

    q_ref, k_ref, v_ref = _reference(M, x, wq, wk, wv)
    assert q.shape == (B, N, D)
    assert k.shape == (B, N + 1, D)
    assert v.shape == (B, N + 1, D)
    assert jnp.allclose(q, q_ref, atol=1e-5, rtol=1e-5)
    assert jnp.allclose(k, k_ref, atol=1e-5, rtol=1e-5)
    assert jnp.allclose(v, v_ref, atol=1e-5, rtol=1e-5)

    print("KERNEL_OK")
</pallas_src>

<mosaic_0001>
module attributes {stable_mosaic.version = 11 : i64} {
  func.func @_qkv_kernel(%arg0: i32, %arg1: memref<2x8x32xf32, #tpu.memory_space<vmem>>, %arg2: memref<2x1x32xf32, #tpu.memory_space<vmem>>, %arg3: memref<32x384xf32, #tpu.memory_space<vmem>>, %arg4: memref<2x8x128xf32, #tpu.memory_space<vmem>>, %arg5: memref<2x9x128xf32, #tpu.memory_space<vmem>>, %arg6: memref<2x9x128xf32, #tpu.memory_space<vmem>>) attributes {dimension_semantics = [#tpu.dimension_semantics<parallel>], iteration_bounds = array<i64: 1>, scalar_prefetch = 0 : i64, scratch_operands = 0 : i64, tpu.core_type = #tpu.core_type<tc>, window_params = [{transform_indices = @transform_0, window_bounds = array<i64: 2, 8, 32>}, {pipeline_mode = #tpu.pipeline_mode<synchronous>, transform_indices = @transform_1, window_bounds = array<i64: 2, 1, 32>}, {pipeline_mode = #tpu.pipeline_mode<synchronous>, transform_indices = @transform_2, window_bounds = array<i64: 32, 384>}, {transform_indices = @transform_3, window_bounds = array<i64: 2, 8, 128>}, {transform_indices = @transform_4, window_bounds = array<i64: 2, 9, 128>}, {transform_indices = @transform_5, window_bounds = array<i64: 2, 9, 128>}]} {
    %c0 = arith.constant 0 : index
    %c0_0 = arith.constant 0 : index
    %c0_1 = arith.constant 0 : index
    %0 = vector.load %arg1[%c0, %c0_0, %c0_1] : memref<2x8x32xf32, #tpu.memory_space<vmem>>, vector<2x8x32xf32>
    %1 = vector.shape_cast %0 : vector<2x8x32xf32> to vector<16x32xf32>
    %c0_2 = arith.constant 0 : index
    %c0_3 = arith.constant 0 : index
    %2 = vector.load %arg3[%c0_2, %c0_3] : memref<32x384xf32, #tpu.memory_space<vmem>>, vector<32x128xf32>
    %cst = arith.constant dense<0.000000e+00> : vector<16x128xf32>
    %3 = tpu.matmul %1, %2, %cst {dimension_numbers = #tpu.dot_dimension_numbers<[1], [0], [0], [1], [0, 0, 1, 1], [], []>} : vector<16x32xf32>, vector<32x128xf32>, vector<16x128xf32> -> vector<16x128xf32>
    %4 = vector.shape_cast %3 : vector<16x128xf32> to vector<2x8x128xf32>
    %c0_4 = arith.constant 0 : index
    %c0_5 = arith.constant 0 : index
    %c0_6 = arith.constant 0 : index
    %5 = vector.load %arg4[%c0_4, %c0_5, %c0_6] : memref<2x8x128xf32, #tpu.memory_space<vmem>>, vector<2x8x128xf32>
    tpu.vector_store %arg4[%c0_4, %c0_5, %c0_6], %4 {strides = array<i32>} : memref<2x8x128xf32, #tpu.memory_space<vmem>>, vector<2x8x128xf32>,
    %c0_7 = arith.constant 0 : index
    %c128 = arith.constant 128 : index
    %6 = vector.load %arg3[%c0_7, %c128] : memref<32x384xf32, #tpu.memory_space<vmem>>, vector<32x128xf32>
    %cst_8 = arith.constant dense<0.000000e+00> : vector<16x128xf32>
    %7 = tpu.matmul %1, %6, %cst_8 {dimension_numbers = #tpu.dot_dimension_numbers<[1], [0], [0], [1], [0, 0, 1, 1], [], []>} : vector<16x32xf32>, vector<32x128xf32>, vector<16x128xf32> -> vector<16x128xf32>
    %8 = vector.shape_cast %7 : vector<16x128xf32> to vector<2x8x128xf32>
    %c0_9 = arith.constant 0 : index
    %c0_10 = arith.constant 0 : index
    %c0_11 = arith.constant 0 : index
    %9 = vector.load %arg5[%c0_9, %c0_10, %c0_11] : memref<2x9x128xf32, #tpu.memory_space<vmem>>, vector<2x8x128xf32>
    tpu.vector_store %arg5[%c0_9, %c0_10, %c0_11], %8 {strides = array<i32>} : memref<2x9x128xf32, #tpu.memory_space<vmem>>, vector<2x8x128xf32>,
    %c0_12 = arith.constant 0 : index
    %c256 = arith.constant 256 : index
    %10 = vector.load %arg3[%c0_12, %c256] : memref<32x384xf32, #tpu.memory_space<vmem>>, vector<32x128xf32>
    %cst_13 = arith.constant dense<0.000000e+00> : vector<16x128xf32>
    %11 = tpu.matmul %1, %10, %cst_13 {dimension_numbers = #tpu.dot_dimension_numbers<[1], [0], [0], [1], [0, 0, 1, 1], [], []>} : vector<16x32xf32>, vector<32x128xf32>, vector<16x128xf32> -> vector<16x128xf32>
    %12 = vector.shape_cast %11 : vector<16x128xf32> to vector<2x8x128xf32>
    %c0_14 = arith.constant 0 : index
    %c0_15 = arith.constant 0 : index
    %c0_16 = arith.constant 0 : index
    %13 = vector.load %arg6[%c0_14, %c0_15, %c0_16] : memref<2x9x128xf32, #tpu.memory_space<vmem>>, vector<2x8x128xf32>
    tpu.vector_store %arg6[%c0_14, %c0_15, %c0_16], %12 {strides = array<i32>} : memref<2x9x128xf32, #tpu.memory_space<vmem>>, vector<2x8x128xf32>,
    %c2_i32 = arith.constant 2 : i32
    %14 = arith.muli %arg0, %c2_i32 : i32
    %15 = tpu.assume_multiple %14, 2 : i32
    %16 = arith.index_cast %15 : i32 to index
    %c0_17 = arith.constant 0 : index
    %c0_18 = arith.constant 0 : index
    %17 = vector.load %arg2[%16, %c0_17, %c0_18] : memref<2x1x32xf32, #tpu.memory_space<vmem>>, vector<2x1x32xf32>
    %18 = vector.shape_cast %17 : vector<2x1x32xf32> to vector<2x32xf32>
    %c0_19 = arith.constant 0 : index
    %c128_20 = arith.constant 128 : index
    %19 = vector.load %arg3[%c0_19, %c128_20] : memref<32x384xf32, #tpu.memory_space<vmem>>, vector<32x256xf32>
    %cst_21 = arith.constant dense<0.000000e+00> : vector<2x256xf32>
    %20 = tpu.matmul %18, %19, %cst_21 {dimension_numbers = #tpu.dot_dimension_numbers<[1], [0], [0], [1], [0, 0, 1, 1], [], []>} : vector<2x32xf32>, vector<32x256xf32>, vector<2x256xf32> -> vector<2x256xf32>
    %21 = vector.extract_strided_slice %20 {offsets = [0, 0], sizes = [2, 128], strides = [1, 1]} : vector<2x256xf32> to vector<2x128xf32>
    %c0_22 = arith.constant 0 : index
    %c8 = arith.constant 8 : index
    %c0_23 = arith.constant 0 : index
    %22 = vector.load %arg5[%c0_22, %c8, %c0_23] : memref<2x9x128xf32, #tpu.memory_space<vmem>>, vector<2x1x128xf32>
    %23 = vector.shape_cast %22 : vector<2x1x128xf32> to vector<2x128xf32>
    %24 = vector.shape_cast %21 : vector<2x128xf32> to vector<2x1x128xf32>
    tpu.vector_store %arg5[%c0_22, %c8, %c0_23], %24 {strides = array<i32>} : memref<2x9x128xf32, #tpu.memory_space<vmem>>, vector<2x1x128xf32>,
    %25 = vector.extract_strided_slice %20 {offsets = [0, 128], sizes = [2, 128], strides = [1, 1]} : vector<2x256xf32> to vector<2x128xf32>
    %c0_24 = arith.constant 0 : index
    %c8_25 = arith.constant 8 : index
    %c0_26 = arith.constant 0 : index
    %26 = vector.load %arg6[%c0_24, %c8_25, %c0_26] : memref<2x9x128xf32, #tpu.memory_space<vmem>>, vector<2x1x128xf32>
    %27 = vector.shape_cast %26 : vector<2x1x128xf32> to vector<2x128xf32>
    %28 = vector.shape_cast %25 : vector<2x128xf32> to vector<2x1x128xf32>
    tpu.vector_store %arg6[%c0_24, %c8_25, %c0_26], %28 {strides = array<i32>} : memref<2x9x128xf32, #tpu.memory_space<vmem>>, vector<2x1x128xf32>,
    return
  }
  func.func @transform_0(%arg0: i32) -> (i32, i32, i32) {
    %c0_i32 = arith.constant 0 : i32
    %c0_i32_0 = arith.constant 0 : i32
    %c0_i32_1 = arith.constant 0 : i32
    return %arg0, %c0_i32, %c0_i32_0 : i32, i32, i32
  }
  func.func @transform_1(%arg0: i32) -> (i32, i32, i32) {
    %c0_i32 = arith.constant 0 : i32
    %c0_i32_0 = arith.constant 0 : i32
    %c0_i32_1 = arith.constant 0 : i32
    %c0_i32_2 = arith.constant 0 : i32
    return %c0_i32, %c0_i32_0, %c0_i32_1 : i32, i32, i32
  }
  func.func @transform_2(%arg0: i32) -> (i32, i32) {
    %c0_i32 = arith.constant 0 : i32
    %c0_i32_0 = arith.constant 0 : i32
    %c0_i32_1 = arith.constant 0 : i32
    return %c0_i32, %c0_i32_0 : i32, i32
  }
  func.func @transform_3(%arg0: i32) -> (i32, i32, i32) {
    %c0_i32 = arith.constant 0 : i32
    %c0_i32_0 = arith.constant 0 : i32
    %c0_i32_1 = arith.constant 0 : i32
    return %arg0, %c0_i32, %c0_i32_0 : i32, i32, i32
  }
  func.func @transform_4(%arg0: i32) -> (i32, i32, i32) {
    %c0_i32 = arith.constant 0 : i32
    %c0_i32_0 = arith.constant 0 : i32
    %c0_i32_1 = arith.constant 0 : i32
    return %arg0, %c0_i32, %c0_i32_0 : i32, i32, i32
  }
  func.func @transform_5(%arg0: i32) -> (i32, i32, i32) {
    %c0_i32 = arith.constant 0 : i32
    %c0_i32_0 = arith.constant 0 : i32
    %c0_i32_1 = arith.constant 0 : i32
    return %arg0, %c0_i32, %c0_i32_0 : i32, i32, i32
  }
}

module attributes {stable_mosaic.version = 11 : i64} {
  func.func @_qkv_kernel(%arg0: i32, %arg1: memref<2x8x32xf32, #tpu.memory_space<vmem>>, %arg2: memref<2x1x32xf32, #tpu.memory_space<vmem>>, %arg3: memref<32x384xf32, #tpu.memory_space<vmem>>, %arg4: memref<2x8x128xf32, #tpu.memory_space<vmem>>, %arg5: memref<2x9x128xf32, #tpu.memory_space<vmem>>, %arg6: memref<2x9x128xf32, #tpu.memory_space<vmem>>) attributes {dimension_semantics = [#tpu.dimension_semantics<parallel>], iteration_bounds = array<i64: 1>, scalar_prefetch = 0 : i64, scratch_operands = 0 : i64, tpu.core_type = #tpu.core_type<tc>, window_params = [{transform_indices = @transform_0, window_bounds = array<i64: 2, 8, 32>}, {pipeline_mode = #tpu.pipeline_mode<synchronous>, transform_indices = @transform_1, window_bounds = array<i64: 2, 1, 32>}, {pipeline_mode = #tpu.pipeline_mode<synchronous>, transform_indices = @transform_2, window_bounds = array<i64: 32, 384>}, {transform_indices = @transform_3, window_bounds = array<i64: 2, 8, 128>}, {transform_indices = @transform_4, window_bounds = array<i64: 2, 9, 128>}, {transform_indices = @transform_5, window_bounds = array<i64: 2, 9, 128>}]} {
    %c0 = arith.constant 0 : index
    %c0_0 = arith.constant 0 : index
    %c0_1 = arith.constant 0 : index
    %0 = vector.load %arg1[%c0, %c0_0, %c0_1] : memref<2x8x32xf32, #tpu.memory_space<vmem>>, vector<2x8x32xf32>
    %1 = vector.shape_cast %0 : vector<2x8x32xf32> to vector<16x32xf32>
    %c0_2 = arith.constant 0 : index
    %c0_3 = arith.constant 0 : index
    %2 = vector.load %arg3[%c0_2, %c0_3] : memref<32x384xf32, #tpu.memory_space<vmem>>, vector<32x128xf32>
    %cst = arith.constant dense<0.000000e+00> : vector<16x128xf32>
    %3 = tpu.matmul %1, %2, %cst {dimension_numbers = #tpu.dot_dimension_numbers<[1], [0], [0], [1], [0, 0, 1, 1], [], []>} : vector<16x32xf32>, vector<32x128xf32>, vector<16x128xf32> -> vector<16x128xf32>
    %4 = vector.shape_cast %3 : vector<16x128xf32> to vector<2x8x128xf32>
    %c0_4 = arith.constant 0 : index
    %c0_5 = arith.constant 0 : index
    %c0_6 = arith.constant 0 : index
    %5 = vector.load %arg4[%c0_4, %c0_5, %c0_6] : memref<2x8x128xf32, #tpu.memory_space<vmem>>, vector<2x8x128xf32>
    tpu.vector_store %arg4[%c0_4, %c0_5, %c0_6], %4 {strides = array<i32>} : memref<2x8x128xf32, #tpu.memory_space<vmem>>, vector<2x8x128xf32>,
    %c0_7 = arith.constant 0 : index
    %c128 = arith.constant 128 : index
    %6 = vector.load %arg3[%c0_7, %c128] : memref<32x384xf32, #tpu.memory_space<vmem>>, vector<32x128xf32>
    %cst_8 = arith.constant dense<0.000000e+00> : vector<16x128xf32>
    %7 = tpu.matmul %1, %6, %cst_8 {dimension_numbers = #tpu.dot_dimension_numbers<[1], [0], [0], [1], [0, 0, 1, 1], [], []>} : vector<16x32xf32>, vector<32x128xf32>, vector<16x128xf32> -> vector<16x128xf32>
    %8 = vector.shape_cast %7 : vector<16x128xf32> to vector<2x8x128xf32>
    %c0_9 = arith.constant 0 : index
    %c0_10 = arith.constant 0 : index
    %c0_11 = arith.constant 0 : index
    %9 = vector.load %arg5[%c0_9, %c0_10, %c0_11] : memref<2x9x128xf32, #tpu.memory_space<vmem>>, vector<2x8x128xf32>
    tpu.vector_store %arg5[%c0_9, %c0_10, %c0_11], %8 {strides = array<i32>} : memref<2x9x128xf32, #tpu.memory_space<vmem>>, vector<2x8x128xf32>,
    %c0_12 = arith.constant 0 : index
    %c256 = arith.constant 256 : index
    %10 = vector.load %arg3[%c0_12, %c256] : memref<32x384xf32, #tpu.memory_space<vmem>>, vector<32x128xf32>
    %cst_13 = arith.constant dense<0.000000e+00> : vector<16x128xf32>
    %11 = tpu.matmul %1, %10, %cst_13 {dimension_numbers = #tpu.dot_dimension_numbers<[1], [0], [0], [1], [0, 0, 1, 1], [], []>} : vector<16x32xf32>, vector<32x128xf32>, vector<16x128xf32> -> vector<16x128xf32>
    %12 = vector.shape_cast %11 : vector<16x128xf32> to vector<2x8x128xf32>
    %c0_14 = arith.constant 0 : index
    %c0_15 = arith.constant 0 : index
    %c0_16 = arith.constant 0 : index
    %13 = vector.load %arg6[%c0_14, %c0_15, %c0_16] : memref<2x9x128xf32, #tpu.memory_space<vmem>>, vector<2x8x128xf32>
    tpu.vector_store %arg6[%c0_14, %c0_15, %c0_16], %12 {strides = array<i32>} : memref<2x9x128xf32, #tpu.memory_space<vmem>>, vector<2x8x128xf32>,
    %c2_i32 = arith.constant 2 : i32
    %14 = arith.muli %arg0, %c2_i32 : i32
    %15 = tpu.assume_multiple %14, 2 : i32
    %16 = arith.index_cast %15 : i32 to index
    %c0_17 = arith.constant 0 : index
    %c0_18 = arith.constant 0 : index
    %17 = vector.load %arg2[%16, %c0_17, %c0_18] : memref<2x1x32xf32, #tpu.memory_space<vmem>>, vector<2x1x32xf32>
    %18 = vector.shape_cast %17 : vector<2x1x32xf32> to vector<2x32xf32>
    %c0_19 = arith.constant 0 : index
    %c128_20 = arith.constant 128 : index
    %19 = vector.load %arg3[%c0_19, %c128_20] : memref<32x384xf32, #tpu.memory_space<vmem>>, vector<32x256xf32>
    %cst_21 = arith.constant dense<0.000000e+00> : vector<2x256xf32>
    %20 = tpu.matmul %18, %19, %cst_21 {dimension_numbers = #tpu.dot_dimension_numbers<[1], [0], [0], [1], [0, 0, 1, 1], [], []>} : vector<2x32xf32>, vector<32x256xf32>, vector<2x256xf32> -> vector<2x256xf32>
    %21 = vector.extract_strided_slice %20 {offsets = [0, 0], sizes = [2, 128], strides = [1, 1]} : vector<2x256xf32> to vector<2x128xf32>
    %c0_22 = arith.constant 0 : index
    %c8 = arith.constant 8 : index
    %c0_23 = arith.constant 0 : index
    %22 = vector.load %arg5[%c0_22, %c8, %c0_23] : memref<2x9x128xf32, #tpu.memory_space<vmem>>, vector<2x1x128xf32>
    %23 = vector.shape_cast %22 : vector<2x1x128xf32> to vector<2x128xf32>
    %24 = vector.shape_cast %21 : vector<2x128xf32> to vector<2x1x128xf32>
    tpu.vector_store %arg5[%c0_22, %c8, %c0_23], %24 {strides = array<i32>} : memref<2x9x128xf32, #tpu.memory_space<vmem>>, vector<2x1x128xf32>,
    %25 = vector.extract_strided_slice %20 {offsets = [0, 128], sizes = [2, 128], strides = [1, 1]} : vector<2x256xf32> to vector<2x128xf32>
    %c0_24 = arith.constant 0 : index
    %c8_25 = arith.constant 8 : index
    %c0_26 = arith.constant 0 : index
    %26 = vector.load %arg6[%c0_24, %c8_25, %c0_26] : memref<2x9x128xf32, #tpu.memory_space<vmem>>, vector<2x1x128xf32>
    %27 = vector.shape_cast %26 : vector<2x1x128xf32> to vector<2x128xf32>
    %28 = vector.shape_cast %25 : vector<2x128xf32> to vector<2x1x128xf32>
    tpu.vector_store %arg6[%c0_24, %c8_25, %c0_26], %28 {strides = array<i32>} : memref<2x9x128xf32, #tpu.memory_space<vmem>>, vector<2x1x128xf32>,
    return
  }
  func.func @transform_0(%arg0: i32) -> (i32, i32, i32) {
    %c0_i32 = arith.constant 0 : i32
    %c0_i32_0 = arith.constant 0 : i32
    %c0_i32_1 = arith.constant 0 : i32
    return %arg0, %c0_i32, %c0_i32_0 : i32, i32, i32
  }
  func.func @transform_1(%arg0: i32) -> (i32, i32, i32) {
    %c0_i32 = arith.constant 0 : i32
    %c0_i32_0 = arith.constant 0 : i32
    %c0_i32_1 = arith.constant 0 : i32
    %c0_i32_2 = arith.constant 0 : i32
    return %c0_i32, %c0_i32_0, %c0_i32_1 : i32, i32, i32
  }
  func.func @transform_2(%arg0: i32) -> (i32, i32) {
    %c0_i32 = arith.constant 0 : i32
    %c0_i32_0 = arith.constant 0 : i32
    %c0_i32_1 = arith.constant 0 : i32
    return %c0_i32, %c0_i32_0 : i32, i32
  }
  func.func @transform_3(%arg0: i32) -> (i32, i32, i32) {
    %c0_i32 = arith.constant 0 : i32
    %c0_i32_0 = arith.constant 0 : i32
    %c0_i32_1 = arith.constant 0 : i32
    return %arg0, %c0_i32, %c0_i32_0 : i32, i32, i32
  }
  func.func @transform_4(%arg0: i32) -> (i32, i32, i32) {
    %c0_i32 = arith.constant 0 : i32
    %c0_i32_0 = arith.constant 0 : i32
    %c0_i32_1 = arith.constant 0 : i32
    return %arg0, %c0_i32, %c0_i32_0 : i32, i32, i32
  }
  func.func @transform_5(%arg0: i32) -> (i32, i32, i32) {
    %c0_i32 = arith.constant 0 : i32
    %c0_i32_0 = arith.constant 0 : i32
    %c0_i32_1 = arith.constant 0 : i32
    return %arg0, %c0_i32, %c0_i32_0 : i32, i32, i32
  }
}

</mosaic_0001>

<bundles_post_ra>
// kernel: tpu_custom_call.1
= control target key start
LH: loop header
LB: loop body
LE: loop exit
PB: predicated region body
PF: predicated region fallthrough
CT: control target
= control target key end

     0   :  { %11 = vsyncpa [#allocation3], 0  ;;  %s744_s0 = inlined_call_operand.hbm [shape: f32[2,8,32], index: 0, kind: input, shape index: {}]   ;;  %s745_s1 = inlined_call_operand.hbm [shape: f32[2,1,32], index: 1, kind: input, shape index: {}]   ;;  %s746_s2 = inlined_call_operand.hbm [shape: f32[32,384], index: 2, kind: input, shape index: {}]   ;;  %s747_s3 = inlined_call_operand.hbm [shape: f32[2,8,128], index: 3, kind: output, shape index: {0}]   ;;  %s748_s4 = inlined_call_operand.vmem [shape: f32[2,9,128], index: 4, kind: output, shape index: {1}]   ;;  %s749_s5 = inlined_call_operand.vmem [shape: f32[2,9,128], index: 5, kind: output, shape index: {2}]  }
   0x1   :  { %12 = vsyncpa [#allocation6], 0 }
   0x2   :  { %13 = vsyncpa [#allocation4], 0  ;;  %s653_s18 = smov [#allocation5]  }
   0x3   :  { %s31_s19 = sshll.u32 %s653_s18, 4  ;;  %s32_s19 = int_to_ptr.vmem [resolvable:$true] %s31_s19 }
   0x4   :  { %s575_s20 = scalar_lea.vmem %s32_s19, 32  ;;  %p580_p1 = scmp.lt.s32.totalorder %s32_s19, %s32_s19 }
   0x5   :  { %p576_p0 = scmp.ne.s32.totalorder %s32_s19, %s575_s20  ;;  %p581_p2 = scmp.lt.s32.totalorder %s575_s20, %s575_s20 }
   0x7   :  { %p582_p3 = por %p581_p2, %p580_p1 }
   0x9   :  { %p583_p4 = pnand %p582_p3, %p576_p0 }
   0xb   :  { %586 = shalt.err (!%p583_p4)
}
   0xc   :  { %s654_s21 = smov 16   ;;  %s655_s22 = smov 1  }
   0xd   :  { %37 = dma.hbm_to_vmem [thread:$0]  %s745_s1, 32, %s32_s19, [#allocation6], %s654_s21, %s654_s21, %s655_s22  }
   0xe   :  { %s656_s25 = smov [#allocation2]  }
   0xf   :  { %s19_s26 = sshll.u32 %s656_s25, 4  ;;  %s20_s26 = int_to_ptr.vmem [resolvable:$true] %s19_s26 }
  0x10   :  { %s595_s27 = scalar_lea.vmem %s20_s26, 256  ;;  %p600_p6 = scmp.lt.s32.totalorder %s20_s26, %s20_s26 }
  0x11   :  { %p596_p5 = scmp.ne.s32.totalorder %s20_s26, %s595_s27  ;;  %p601_p7 = scmp.lt.s32.totalorder %s595_s27, %s595_s27 }
  0x13   :  { %p602_p8 = por %p601_p7, %p600_p6 }
  0x15   :  { %p603_p9 = pnand %p602_p8, %p596_p5 }
  0x17   :  { %606 = shalt.err (!%p603_p9)
}
  0x18   :  { %s657_s28 = smov 128   ;;  %s658_s29 = smov 8  }
  0x19   :  { %25 = dma.hbm_to_vmem [thread:$0]  %s744_s0, 256, %s20_s26, [#allocation3], %s657_s28, %s657_s28, %s658_s29  }
  0x1a   :  { %s659_s1 = smov [#allocation7]  }
  0x1b   :  { %s43_s7 = sshll.u32 %s659_s1, 4  ;;  %s44_s7 = int_to_ptr.vmem [resolvable:$true] %s43_s7 }
  0x1c   :  { %s615_s8 = scalar_lea.vmem %s44_s7, 1536  ;;  %p620_p11 = scmp.lt.s32.totalorder %s44_s7, %s44_s7 }
  0x1d   :  { %p616_p10 = scmp.ne.s32.totalorder %s44_s7, %s615_s8  ;;  %p621_p12 = scmp.lt.s32.totalorder %s615_s8, %s615_s8 }
  0x1f   :  { %p622_p13 = por %p621_p12, %p620_p11 }
  0x21   :  { %p623_p0 = pnand %p622_p13, %p616_p10 }
  0x23   :  { %626 = shalt.err (!%p623_p0)
}
  0x24   :  { %s660_s9 = smov 384   ;;  %s661_s10 = smov 24  }
  0x25   :  { %49 = dma.hbm_to_vmem [thread:$0]  %s746_s2, 1536, %s44_s7, [#allocation6], %s660_s9, %s660_s9, %s661_s10  }
  0x26   :  { %647 = dma.done.wait [#allocation3], 256  }
  0x27   :  { %648 = vsyncadd [#allocation3], 4294967040 }
  0x28   :  { %649 = dma.done.wait [#allocation6], 1568  }
  0x29   :  { %650 = vsyncadd [#allocation6], 4294965728  ;;  %v662_v0 = vmov 1966171168   ;;  %v329_v2 = vlaneseq  ;;  %v152_v3 = vld [vmem:[#allocation7 + $0x50] sm:$0xff]  ;;  %v64_v4 = vld [vmem:[#allocation7 + $0x48] sm:$0xff] }
  0x2a   :  { %v327_v1 = vunpack.c.l.s4 %v662_v0  ;;  %v151_v5 = vld [vmem:[#allocation7 + $0x38] sm:$0xff]  ;;  %533 = vmatprep.subr.mxu1 %v152_v3  ;;  %522 = vmatprep.subr.mxu0 %v64_v4  ;;  %v63_v6 = vld [vmem:[#allocation7 + $0x30] sm:$0xff]  ;;  %v150_v7 = vld [vmem:[#allocation7 + $0x20] sm:$0xff]  ;;  %vm65_vm0 = vcmask 261120   ;;  %v663_v25 = vmov 0.0   ;;  %s664_s13 = smov [#allocation8]  }
  0x2b   :  { %534 = vmatpush3.msra.mxu1 %v152_v3  ;;  %523 = vmatpush3.msra.mxu0 %v64_v4  ;;  %v62_v8 = vld [vmem:[#allocation7 + $0x18] sm:$0xff]  ;;  %v330_v10 = vshrl.u32 %v329_v2, 7  ;;  %v149_v11 = vld [vmem:[#allocation7 + $0x8] sm:$0xff]  ;;  %v61_v14 = vld [vmem:[#allocation7] sm:$0xff]  ;;  %s472_s14 = sshll.u32 %s664_s13, 4  ;;  %s473_s14 = int_to_ptr.vmem [resolvable:$true] %s472_s14 }
  0x2c   :  { %535 = vmatprep.subr.mxu1 %v151_v5  ;;  %524 = vmatprep.subr.mxu0 %v63_v6  ;;  %v328_v9 = vunpack.c.0.s8 %v327_v1  ;;  %v59_v12 = vld [vmem:[#allocation2] sm:$0xff]  ;;  %v313_v13 = vld [vmem:[#allocation5] sm:$0x1]  ;;  %v314_v15 = vld [vmem:[#allocation5 + $0x1] sm:$0x1]  ;;  %s627_s17 = scalar_lea.vmem %s473_s14, 256  ;;  %p632_p2 = scmp.lt.s32.totalorder %s473_s14, %s473_s14 }
  0x2d   :  { %536 = vmatpush3.msra.mxu1 %v151_v5  ;;  %525 = vmatpush3.msra.mxu0 %v63_v6  ;;  %v60_v16 = vld [vmem:[#allocation2 + $0x8] sm:$0xff]  ;;  %v325_v18 = vcombine.low %v313_v13, %v314_v15  ;;  %v320_v20 = vld [vmem:[#allocation7 + $0x40] sm:$0xff]  ;;  %v318_v21 = vld [vmem:[#allocation7 + $0x28] sm:$0xff]  ;;  %p628_p1 = scmp.ne.s32.totalorder %s473_s14, %s627_s17  ;;  %p633_p3 = scmp.lt.s32.totalorder %s627_s17, %s627_s17 }
  0x2e   :  { %537 = vmatprep.subr.mxu1 %v150_v7  ;;  %526 = vmatprep.subr.mxu0 %v62_v8  ;;  %v322_v17 = vld [vmem:[#allocation7 + $0x58] sm:$0xff]  ;;  %v331_v19 = vsub.s32 %v328_v9, %v330_v10  ;;  %v316_v23 = vld [vmem:[#allocation7 + $0x10] sm:$0xff] }
  0x2f   :  { %538 = vmatpush3.msra.mxu1 %v150_v7  ;;  %527 = vmatpush3.msra.mxu0 %v62_v8  ;;  %p634_p4 = por %p633_p3, %p632_p2 }
  0x30   :  { %539 = vmatprep.subr.mxu1 %v149_v11  ;;  %541 = vmatprep.mubr.msk.f32.mxu1 %vm65_vm0, %v59_v12  ;;  %v332_v22 = vrot.slane %v325_v18, %v331_v19 }
  0x31   :  { %540 = vmatpush3.msra.mxu1 %v149_v11  ;;  %528 = vmatprep.subr.mxu0 %v61_v14  ;;  %p635_p5 = pnand %p634_p4, %p628_p1 }
  0x32   :  { %542 = vmatmul.mubr.msk.f32.vlgmr.msra.gmra.mxu1 %vm65_vm0, %v60_v16  ;;  %366 = vmatprep.subr.mxu1 %v322_v17  ;;  %v339_v24 = vrot.slane %v332_v22, %v331_v19 }
  0x33   :  { %529 = vmatpush3.msra.mxu0 %v61_v14  ;;  %367 = vmatpush1.msra.mxu1 %v152_v3 }
  0x34   :  { %530 = vmatprep.mubr.msk.f32.mxu0 %vm65_vm0, %v59_v12  ;;  %544 = vmatprep.subr.mxu0 %v322_v17 }
  0x35   :  { %368 = vmatprep.subr.mxu1 %v320_v20  ;;  %531 = vmatmul.mubr.msk.f32.vlgmr.msra.gmra.mxu0 %vm65_vm0, %v60_v16 }
  0x36   :  { %545 = vmatpush3.msra.mxu0 %v322_v17  ;;  %369 = vmatpush1.msra.mxu1 %v151_v5 }
  0x37   :  { %546 = vmatprep.subr.mxu0 %v320_v20  ;;  %370 = vmatprep.subr.mxu1 %v318_v21 }
  0x38   :  { %547 = vmatpush3.msra.mxu0 %v320_v20  ;;  %371 = vmatpush1.msra.mxu1 %v150_v7 }
  0x39   :  { %548 = vmatprep.subr.mxu0 %v318_v21  ;;  %372 = vmatprep.subr.mxu1 %v316_v23 }
  0x3a   :  { %549 = vmatpush3.msra.mxu0 %v318_v21  ;;  %373 = vmatpush1.msra.mxu1 %v149_v11 }
  0x3b   :  { %406 = vmatprep.mubr.f32.mxu1 %v663_v25  ;;  %550 = vmatprep.subr.mxu0 %v316_v23 }
  0x3c   :  { %499 = vmatmul.mubr.msk.f32.vlgmr.msra.gmra.mxu1 %vm65_vm0, %v339_v24  ;;  %551 = vmatpush3.msra.mxu0 %v316_v23 }
  0x3d   :  { %552 = vmatprep.mubr.msk.f32.mxu0 %vm65_vm0, %v59_v12 }
  0x3e   :  { %553 = vmatmul.mubr.msk.f32.vlgmr.msra.gmra.mxu0 %vm65_vm0, %v60_v16 }
  0xf2   :  { %v543_v26 = vpop.f32.mrf.mxu1 }
  0xf3   :  { %229 = vst [vmem:[%s748_s4 + $0x10] sm:$0xff] %v543_v26 }
  0xf4   :  { %v219_v27 = vpop.f32.mrf.mxu1 }
  0xf5   :  { %228 = vst [vmem:[%s748_s4] sm:$0xff] %v219_v27  ;;  %v532_v28 = vpop.f32.mrf.mxu0 }
  0xf6   :  { %148 = vst [vmem:[#allocation8 + $0x8] sm:$0xff] %v532_v28 }
  0xf7   :  { %v138_v29 = vpop.f32.mrf.mxu0 }
  0xf8   :  { %147 = vst [vmem:[#allocation8] sm:$0xff] %v138_v29 }
  0xf9   :  { %638 = shalt.err (!%p635_p5)
}
  0xfa   :  { %478 = dma.vmem_to_hbm [thread:$0]  %s473_s14, 256, %s747_s3, [#allocation4], %s657_s28, %s657_s28, %s658_s29  }
  0xfc   :  { %v408_v30 = vpop.f32.mrf.mxu1 }
  0xfd   :  { %v420_v31 = vrot.slane %v408_v30, %v331_v19 }
  0xfe   :  { %v554_v32 = vpop.f32.mrf.mxu0  ;;  %v410_v33 = vpop.f32.mrf.mxu1 }
  0xff   :  { %v421_v34 = vcombine.high %v420_v31, %v420_v31  ;;  %500 = vst.sshfl [vmem:[%s748_s4 + $0x8] sm:$0x1 pattern:$0x73625140] %v420_v31  ;;  %310 = vst [vmem:[%s749_s5 + $0x10] sm:$0xff] %v554_v32  ;;  %v447_v35 = vrot.slane %v410_v33, %v331_v19 }
 0x100   :  { %v300_v36 = vpop.f32.mrf.mxu0 }
 0x101   :  { %501 = vst.sshfl [vmem:[%s748_s4 + $0x18] sm:$0x1 pattern:$0x73625140] %v421_v34  ;;  %v448_v37 = vcombine.high %v447_v35, %v447_v35  ;;  %309 = vst [vmem:[%s749_s5] sm:$0xff] %v300_v36 }
 0x102   :  { %502 = vst.sshfl [vmem:[%s749_s5 + $0x8] sm:$0x1 pattern:$0x73625140] %v447_v35 }
 0x103   :  { %503 = vst.sshfl [vmem:[%s749_s5 + $0x18] sm:$0x1 pattern:$0x73625140] %v448_v37 }
 0x104   :  { %651 = dma.done.wait [#allocation4], 256  }
 0x105   :  { %652 = vsyncadd [#allocation4], 4294967040 }
 0x106   :  { %490 = vsyncpa [#allocation3], 1 }
 0x107   :  { %491 = vsyncpa [#allocation6], 1 }
 0x108   :  { %492 = vsyncpa [#allocation4], 1 }

// kernel: tpu_custom_call.1
= control target key start
LH: loop header
LB: loop body
LE: loop exit
PB: predicated region body
PF: predicated region fallthrough
CT: control target
= control target key end

     0   :  { %11 = vsyncpa [#allocation3], 0  ;;  %s744_s0 = inlined_call_operand.hbm [shape: f32[2,8,32], index: 0, kind: input, shape index: {}]   ;;  %s745_s1 = inlined_call_operand.hbm [shape: f32[2,1,32], index: 1, kind: input, shape index: {}]   ;;  %s746_s2 = inlined_call_operand.hbm [shape: f32[32,384], index: 2, kind: input, shape index: {}]   ;;  %s747_s3 = inlined_call_operand.hbm [shape: f32[2,8,128], index: 3, kind: output, shape index: {0}]   ;;  %s748_s4 = inlined_call_operand.vmem [shape: f32[2,9,128], index: 4, kind: output, shape index: {1}]   ;;  %s749_s5 = inlined_call_operand.vmem [shape: f32[2,9,128], index: 5, kind: output, shape index: {2}]  }
   0x1   :  { %12 = vsyncpa [#allocation6], 0 }
   0x2   :  { %13 = vsyncpa [#allocation4], 0  ;;  %s653_s18 = smov [#allocation5]  }
   0x3   :  { %s31_s19 = sshll.u32 %s653_s18, 4  ;;  %s32_s19 = int_to_ptr.vmem [resolvable:$true] %s31_s19 }
   0x4   :  { %s575_s20 = scalar_lea.vmem %s32_s19, 32  ;;  %p580_p1 = scmp.lt.s32.totalorder %s32_s19, %s32_s19 }
   0x5   :  { %p576_p0 = scmp.ne.s32.totalorder %s32_s19, %s575_s20  ;;  %p581_p2 = scmp.lt.s32.totalorder %s575_s20, %s575_s20 }
   0x7   :  { %p582_p3 = por %p581_p2, %p580_p1 }
   0x9   :  { %p583_p4 = pnand %p582_p3, %p576_p0 }
   0xb   :  { %586 = shalt.err (!%p583_p4)
}
   0xc   :  { %s654_s21 = smov 16   ;;  %s655_s22 = smov 1  }
   0xd   :  { %37 = dma.hbm_to_vmem [thread:$0]  %s745_s1, 32, %s32_s19, [#allocation6], %s654_s21, %s654_s21, %s655_s22  }
   0xe   :  { %s656_s25 = smov [#allocation2]  }
   0xf   :  { %s19_s26 = sshll.u32 %s656_s25, 4  ;;  %s20_s26 = int_to_ptr.vmem [resolvable:$true] %s19_s26 }
  0x10   :  { %s595_s27 = scalar_lea.vmem %s20_s26, 256  ;;  %p600_p6 = scmp.lt.s32.totalorder %s20_s26, %s20_s26 }
  0x11   :  { %p596_p5 = scmp.ne.s32.totalorder %s20_s26, %s595_s27  ;;  %p601_p7 = scmp.lt.s32.totalorder %s595_s27, %s595_s27 }
  0x13   :  { %p602_p8 = por %p601_p7, %p600_p6 }
  0x15   :  { %p603_p9 = pnand %p602_p8, %p596_p5 }
  0x17   :  { %606 = shalt.err (!%p603_p9)
}
  0x18   :  { %s657_s28 = smov 128   ;;  %s658_s29 = smov 8  }
  0x19   :  { %25 = dma.hbm_to_vmem [thread:$0]  %s744_s0, 256, %s20_s26, [#allocation3], %s657_s28, %s657_s28, %s658_s29  }
  0x1a   :  { %s659_s1 = smov [#allocation7]  }
  0x1b   :  { %s43_s7 = sshll.u32 %s659_s1, 4  ;;  %s44_s7 = int_to_ptr.vmem [resolvable:$true] %s43_s7 }
  0x1c   :  { %s615_s8 = scalar_lea.vmem %s44_s7, 1536  ;;  %p620_p11 = scmp.lt.s32.totalorder %s44_s7, %s44_s7 }
  0x1d   :  { %p616_p10 = scmp.ne.s32.totalorder %s44_s7, %s615_s8  ;;  %p621_p12 = scmp.lt.s32.totalorder %s615_s8, %s615_s8 }
  0x1f   :  { %p622_p13 = por %p621_p12, %p620_p11 }
  0x21   :  { %p623_p0 = pnand %p622_p13, %p616_p10 }
  0x23   :  { %626 = shalt.err (!%p623_p0)
}
  0x24   :  { %s660_s9 = smov 384   ;;  %s661_s10 = smov 24  }
  0x25   :  { %49 = dma.hbm_to_vmem [thread:$0]  %s746_s2, 1536, %s44_s7, [#allocation6], %s660_s9, %s660_s9, %s661_s10  }
  0x26   :  { %647 = dma.done.wait [#allocation3], 256  }
  0x27   :  { %648 = vsyncadd [#allocation3], 4294967040 }
  0x28   :  { %649 = dma.done.wait [#allocation6], 1568  }
  0x29   :  { %650 = vsyncadd [#allocation6], 4294965728  ;;  %v662_v0 = vmov 1966171168   ;;  %v329_v2 = vlaneseq  ;;  %v152_v3 = vld [vmem:[#allocation7 + $0x50] sm:$0xff]  ;;  %v64_v4 = vld [vmem:[#allocation7 + $0x48] sm:$0xff] }
  0x2a   :  { %v327_v1 = vunpack.c.l.s4 %v662_v0  ;;  %v151_v5 = vld [vmem:[#allocation7 + $0x38] sm:$0xff]  ;;  %533 = vmatprep.subr.mxu1 %v152_v3  ;;  %522 = vmatprep.subr.mxu0 %v64_v4  ;;  %v63_v6 = vld [vmem:[#allocation7 + $0x30] sm:$0xff]  ;;  %v150_v7 = vld [vmem:[#allocation7 + $0x20] sm:$0xff]  ;;  %vm65_vm0 = vcmask 261120   ;;  %v663_v25 = vmov 0.0   ;;  %s664_s13 = smov [#allocation8]  }
  0x2b   :  { %534 = vmatpush3.msra.mxu1 %v152_v3  ;;  %523 = vmatpush3.msra.mxu0 %v64_v4  ;;  %v62_v8 = vld [vmem:[#allocation7 + $0x18] sm:$0xff]  ;;  %v330_v10 = vshrl.u32 %v329_v2, 7  ;;  %v149_v11 = vld [vmem:[#allocation7 + $0x8] sm:$0xff]  ;;  %v61_v14 = vld [vmem:[#allocation7] sm:$0xff]  ;;  %s472_s14 = sshll.u32 %s664_s13, 4  ;;  %s473_s14 = int_to_ptr.vmem [resolvable:$true] %s472_s14 }
  0x2c   :  { %535 = vmatprep.subr.mxu1 %v151_v5  ;;  %524 = vmatprep.subr.mxu0 %v63_v6  ;;  %v328_v9 = vunpack.c.0.s8 %v327_v1  ;;  %v59_v12 = vld [vmem:[#allocation2] sm:$0xff]  ;;  %v313_v13 = vld [vmem:[#allocation5] sm:$0x1]  ;;  %v314_v15 = vld [vmem:[#allocation5 + $0x1] sm:$0x1]  ;;  %s627_s17 = scalar_lea.vmem %s473_s14, 256  ;;  %p632_p2 = scmp.lt.s32.totalorder %s473_s14, %s473_s14 }
  0x2d   :  { %536 = vmatpush3.msra.mxu1 %v151_v5  ;;  %525 = vmatpush3.msra.mxu0 %v63_v6  ;;  %v60_v16 = vld [vmem:[#allocation2 + $0x8] sm:$0xff]  ;;  %v325_v18 = vcombine.low %v313_v13, %v314_v15  ;;  %v320_v20 = vld [vmem:[#allocation7 + $0x40] sm:$0xff]  ;;  %v318_v21 = vld [vmem:[#allocation7 + $0x28] sm:$0xff]  ;;  %p628_p1 = scmp.ne.s32.totalorder %s473_s14, %s627_s17  ;;  %p633_p3 = scmp.lt.s32.totalorder %s627_s17, %s627_s17 }
  0x2e   :  { %537 = vmatprep.subr.mxu1 %v150_v7  ;;  %526 = vmatprep.subr.mxu0 %v62_v8  ;;  %v322_v17 = vld [vmem:[#allocation7 + $0x58] sm:$0xff]  ;;  %v331_v19 = vsub.s32 %v328_v9, %v330_v10  ;;  %v316_v23 = vld [vmem:[#allocation7 + $0x10] sm:$0xff] }
  0x2f   :  { %538 = vmatpush3.msra.mxu1 %v150_v7  ;;  %527 = vmatpush3.msra.mxu0 %v62_v8  ;;  %p634_p4 = por %p633_p3, %p632_p2 }
  0x30   :  { %539 = vmatprep.subr.mxu1 %v149_v11  ;;  %541 = vmatprep.mubr.msk.f32.mxu1 %vm65_vm0, %v59_v12  ;;  %v332_v22 = vrot.slane %v325_v18, %v331_v19 }
  0x31   :  { %540 = vmatpush3.msra.mxu1 %v149_v11  ;;  %528 = vmatprep.subr.mxu0 %v61_v14  ;;  %p635_p5 = pnand %p634_p4, %p628_p1 }
  0x32   :  { %542 = vmatmul.mubr.msk.f32.vlgmr.msra.gmra.mxu1 %vm65_vm0, %v60_v16  ;;  %366 = vmatprep.subr.mxu1 %v322_v17  ;;  %v339_v24 = vrot.slane %v332_v22, %v331_v19 }
  0x33   :  { %529 = vmatpush3.msra.mxu0 %v61_v14  ;;  %367 = vmatpush1.msra.mxu1 %v152_v3 }
  0x34   :  { %530 = vmatprep.mubr.msk.f32.mxu0 %vm65_vm0, %v59_v12  ;;  %544 = vmatprep.subr.mxu0 %v322_v17 }
  0x35   :  { %368 = vmatprep.subr.mxu1 %v320_v20  ;;  %531 = vmatmul.mubr.msk.f32.vlgmr.msra.gmra.mxu0 %vm65_vm0, %v60_v16 }
  0x36   :  { %545 = vmatpush3.msra.mxu0 %v322_v17  ;;  %369 = vmatpush1.msra.mxu1 %v151_v5 }
  0x37   :  { %546 = vmatprep.subr.mxu0 %v320_v20  ;;  %370 = vmatprep.subr.mxu1 %v318_v21 }
  0x38   :  { %547 = vmatpush3.msra.mxu0 %v320_v20  ;;  %371 = vmatpush1.msra.mxu1 %v150_v7 }
  0x39   :  { %548 = vmatprep.subr.mxu0 %v318_v21  ;;  %372 = vmatprep.subr.mxu1 %v316_v23 }
  0x3a   :  { %549 = vmatpush3.msra.mxu0 %v318_v21  ;;  %373 = vmatpush1.msra.mxu1 %v149_v11 }
  0x3b   :  { %406 = vmatprep.mubr.f32.mxu1 %v663_v25  ;;  %550 = vmatprep.subr.mxu0 %v316_v23 }
  0x3c   :  { %499 = vmatmul.mubr.msk.f32.vlgmr.msra.gmra.mxu1 %vm65_vm0, %v339_v24  ;;  %551 = vmatpush3.msra.mxu0 %v316_v23 }
  0x3d   :  { %552 = vmatprep.mubr.msk.f32.mxu0 %vm65_vm0, %v59_v12 }
  0x3e   :  { %553 = vmatmul.mubr.msk.f32.vlgmr.msra.gmra.mxu0 %vm65_vm0, %v60_v16 }
  0xf2   :  { %v543_v26 = vpop.f32.mrf.mxu1 }
  0xf3   :  { %229 = vst [vmem:[%s748_s4 + $0x10] sm:$0xff] %v543_v26 }
  0xf4   :  { %v219_v27 = vpop.f32.mrf.mxu1 }
  0xf5   :  { %228 = vst [vmem:[%s748_s4] sm:$0xff] %v219_v27  ;;  %v532_v28 = vpop.f32.mrf.mxu0 }
  0xf6   :  { %148 = vst [vmem:[#allocation8 + $0x8] sm:$0xff] %v532_v28 }
  0xf7   :  { %v138_v29 = vpop.f32.mrf.mxu0 }
  0xf8   :  { %147 = vst [vmem:[#allocation8] sm:$0xff] %v138_v29 }
  0xf9   :  { %638 = shalt.err (!%p635_p5)
}
  0xfa   :  { %478 = dma.vmem_to_hbm [thread:$0]  %s473_s14, 256, %s747_s3, [#allocation4], %s657_s28, %s657_s28, %s658_s29  }
  0xfc   :  { %v408_v30 = vpop.f32.mrf.mxu1 }
  0xfd   :  { %v420_v31 = vrot.slane %v408_v30, %v331_v19 }
  0xfe   :  { %v554_v32 = vpop.f32.mrf.mxu0  ;;  %v410_v33 = vpop.f32.mrf.mxu1 }
  0xff   :  { %v421_v34 = vcombine.high %v420_v31, %v420_v31  ;;  %500 = vst.sshfl [vmem:[%s748_s4 + $0x8] sm:$0x1 pattern:$0x73625140] %v420_v31  ;;  %310 = vst [vmem:[%s749_s5 + $0x10] sm:$0xff] %v554_v32  ;;  %v447_v35 = vrot.slane %v410_v33, %v331_v19 }
 0x100   :  { %v300_v36 = vpop.f32.mrf.mxu0 }
 0x101   :  { %501 = vst.sshfl [vmem:[%s748_s4 + $0x18] sm:$0x1 pattern:$0x73625140] %v421_v34  ;;  %v448_v37 = vcombine.high %v447_v35, %v447_v35  ;;  %309 = vst [vmem:[%s749_s5] sm:$0xff] %v300_v36 }
 0x102   :  { %502 = vst.sshfl [vmem:[%s749_s5 + $0x8] sm:$0x1 pattern:$0x73625140] %v447_v35 }
 0x103   :  { %503 = vst.sshfl [vmem:[%s749_s5 + $0x18] sm:$0x1 pattern:$0x73625140] %v448_v37 }
 0x104   :  { %651 = dma.done.wait [#allocation4], 256  }
 0x105   :  { %652 = vsyncadd [#allocation4], 4294967040 }
 0x106   :  { %490 = vsyncpa [#allocation3], 1 }
 0x107   :  { %491 = vsyncpa [#allocation6], 1 }
 0x108   :  { %492 = vsyncpa [#allocation4], 1 }

</bundles_post_ra>
